<compile_context>
chip_gen: v5e
topology: v5e:2x2
jax: 0.10.0
libtpu: 0.0.40
codegen_flags: <defaults>
</compile_context>

<pallas_src>
import jax
import jax.numpy as jnp
import numpy as np
from jax.experimental import pallas as pl
from jax.experimental.pallas import tpu as pltpu


# ------------------------------- kernel body --------------------------------

def make_kernel(C_in, planes, L, L1, B, stride, has_proj):
    Lp = L + 2           # per-sample padded segment length (conv1 input layout)
    S2 = L1 + 2          # per-sample padded segment length (conv2 input / output)
    W = B * Lp
    W2 = B * S2

    def taps(v, width, c):
        # (c, width) -> (3*c, width): row block k holds v shifted by (k-1) lanes
        # with zero fill, i.e. the im2col-along-K operand for a k=3 "same" conv.
        z = jnp.zeros((c, 1), v.dtype)
        vp = jnp.concatenate([z, v, z], axis=1)                 # (c, width + 2)
        return jnp.concatenate([vp[:, 0:width],
                                vp[:, 1:width + 1],
                                vp[:, 2:width + 2]], axis=0)    # (3*c, width)

    def kernel(*refs):
        if has_proj:
            (x_ref, w1_ref, s1_ref, b1_ref, w2_ref, s2_ref, b2_ref,
             aux_ref, ws_ref, ss_ref, bs_ref, out_ref) = refs
        else:
            (x_ref, w1_ref, s1_ref, b1_ref, w2_ref, s2_ref, b2_ref,
             aux_ref, out_ref) = refs

        x = x_ref[...]                                          # (C_in, W) f32

        # ---- conv1: one fused-tap bf16 matmul, K = 3*C_in, N = W lanes ------
        xs = taps(x, W, C_in).astype(jnp.bfloat16)              # (3*C_in, W)
        r = jnp.dot(w1_ref[...], xs, preferred_element_type=jnp.float32)
        r = jnp.maximum(r * s1_ref[...] + b1_ref[...], 0.0)     # bn1 + relu (f32)

        # ---- stride downsample + re-insert conv2 zero padding ---------------
        if stride == 1:
            # aux = (1, W2) 0/1 mask zeroing each segment's edge columns
            # (Lp == S2, so the layout is already aligned).
            p = r * aux_ref[...]                                # (planes, W2)
        else:
            # aux = hoisted (L, L1+2) selection matrix with zero edge columns.
            dselp = aux_ref[...]
            p = jnp.concatenate(
                [jnp.dot(r[:, b * Lp + 1:b * Lp + 1 + L], dselp,
                         preferred_element_type=jnp.float32)
                 for b in range(B)], axis=1)                    # (planes, W2)

        # ---- conv2: one fused-tap bf16 matmul, K = 3*planes ------------------
        ps = taps(p, W2, planes).astype(jnp.bfloat16)           # (3*planes, W2)
        o2 = jnp.dot(w2_ref[...], ps, preferred_element_type=jnp.float32)
        o2 = o2 * s2_ref[...] + b2_ref[...]                     # bn2 (f32)

        # ---- shortcut --------------------------------------------------------
        if has_proj:
            if stride == 1:
                xds = x                                         # aligned (Lp == S2)
            else:
                dselp = aux_ref[...]
                # downsample BEFORE projecting (fewer MXU flops).
                xds = jnp.concatenate(
                    [jnp.dot(x[:, b * Lp + 1:b * Lp + 1 + L], dselp,
                             preferred_element_type=jnp.float32)
                     for b in range(B)], axis=1)                # (C_in, W2)
            sc = jnp.dot(ws_ref[...], xds.astype(jnp.bfloat16),
                         preferred_element_type=jnp.float32)
            sc = sc * ss_ref[...] + bs_ref[...]
        else:
            sc = x                                              # identity shortcut

        out_ref[...] = jnp.maximum(o2 + sc, 0.0)

    return kernel


# --------------------------------- wrapper ----------------------------------

def _pick_batch_tile(N, Lp, lane_target):
    divs = [d for d in range(1, N + 1) if N % d == 0 and d * Lp <= lane_target]
    if not divs:
        return 1
    B = max(divs)
    # Prefer >=2 grid steps (v7x has 2 TensorCores) if each step stays
    # reasonably lane-dense (>=256 lanes).
    two_step = [d for d in divs if (N // d) >= 2 and d * Lp >= 256]
    if two_step:
        B = max(two_step)
    return B


def basic_block_pallas(x, kp, stride, *, batch_tile=None, lane_target=2048):
    """x: (N, C_in, L) float32. Returns (N, planes, L_out) float32."""
    N, C_in, L = x.shape
    planes = kp["s1"].shape[0]
    L1 = (L - 1) // stride + 1
    has_proj = (stride != 1) or (C_in != planes)
    Lp, S2 = L + 2, L1 + 2

    B = batch_tile if batch_tile is not None else _pick_batch_tile(N, Lp, lane_target)
    assert N % B == 0, (N, B)
    G = N // B
    W, W2 = B * Lp, B * S2

    # Single fused layout pass: pad + channel-major + group B samples on lanes.
    xp = jnp.pad(x, ((0, 0), (0, 0), (1, 1)))                    # (N, C, Lp)
    xp = xp.reshape(G, B, C_in, Lp).transpose(0, 2, 1, 3).reshape(G, C_in, W)

    if stride == 1:
        col = jnp.arange(W2) % S2
        aux = ((col != 0) & (col != S2 - 1)).astype(jnp.float32).reshape(1, W2)
        aux_spec = pl.BlockSpec((1, W2), lambda g: (0, 0))
    else:
        dsel = (jnp.arange(L)[:, None] == stride * jnp.arange(L1)[None, :])
        aux = jnp.pad(dsel.astype(jnp.float32), ((0, 0), (1, 1)))  # (L, S2)
        aux_spec = pl.BlockSpec((L, S2), lambda g: (0, 0))

    in_arrays = [xp, kp["w1f"], kp["s1"], kp["b1"],
                 kp["w2f"], kp["s2"], kp["b2"], aux]
    in_specs = [
        pl.BlockSpec((None, C_in, W), lambda g: (g, 0, 0)),
        pl.BlockSpec((planes, 3 * C_in), lambda g: (0, 0)),
        pl.BlockSpec((planes, 1), lambda g: (0, 0)),
        pl.BlockSpec((planes, 1), lambda g: (0, 0)),
        pl.BlockSpec((planes, 3 * planes), lambda g: (0, 0)),
        pl.BlockSpec((planes, 1), lambda g: (0, 0)),
        pl.BlockSpec((planes, 1), lambda g: (0, 0)),
        aux_spec,
    ]
    if has_proj:
        in_arrays += [kp["ws"], kp["ss"], kp["bs"]]
        in_specs += [
            pl.BlockSpec((planes, C_in), lambda g: (0, 0)),
            pl.BlockSpec((planes, 1), lambda g: (0, 0)),
            pl.BlockSpec((planes, 1), lambda g: (0, 0)),
        ]

    kernel = make_kernel(C_in, planes, L, L1, B, stride, has_proj)

    o_flat = pl.pallas_call(
        kernel,
        out_shape=jax.ShapeDtypeStruct((G, planes, W2), jnp.float32),
        grid=(G,),
        in_specs=in_specs,
        out_specs=pl.BlockSpec((None, planes, W2), lambda g: (g, 0, 0)),
        compiler_params=pltpu.CompilerParams(
            dimension_semantics=("parallel",),
            vmem_limit_bytes=48 * 1024 * 1024),
    )(*in_arrays)

    # Strip per-sample pad columns and return to (N, planes, L1) layout
    # (pure layout plumbing; fused by XLA).
    out = o_flat.reshape(G, planes, B, S2)[:, :, :, 1:1 + L1]
    out = out.transpose(0, 2, 1, 3).reshape(N, planes, L1)
    return out


# ----------------------------- parameter setup ------------------------------

def init_params(key, in_planes, planes, stride, eps=1e-5):
    ks = jax.random.split(key, 6)

    def bn_raw(k):
        k1, k2, k3, k4 = jax.random.split(k, 4)
        gamma = 1.0 + 0.1 * jax.random.normal(k1, (planes,), jnp.float32)
        beta = 0.1 * jax.random.normal(k2, (planes,), jnp.float32)
        mean = 0.05 * jax.random.normal(k3, (planes,), jnp.float32)
        var = 1.0 + 0.1 * jax.random.uniform(k4, (planes,), jnp.float32)
        return gamma, beta, mean, var

    raw = {
        "w1": 0.3 * jax.random.normal(ks[0], (planes, in_planes, 3), jnp.float32),
        "w2": 0.3 * jax.random.normal(ks[1], (planes, planes, 3), jnp.float32),
        "bn1": bn_raw(ks[2]),
        "bn2": bn_raw(ks[3]),
        "ws": None,
        "bns": None,
    }
    has_proj = (stride != 1) or (in_planes != planes)
    if has_proj:
        raw["ws"] = 0.3 * jax.random.normal(ks[4], (planes, in_planes, 1), jnp.float32)
        raw["bns"] = bn_raw(ks[5])

    def fold(bn):
        g, b, m, v = bn
        s = g / jnp.sqrt(v + eps)
        return s.reshape(-1, 1), (b - m * s).reshape(-1, 1)

    # Fused-tap weight layout: [p, k*C + c] = w[p, c, k]; cast to bf16 for MXU.
    kp = {
        "w1f": jnp.transpose(raw["w1"], (0, 2, 1))
                  .reshape(planes, 3 * in_planes).astype(jnp.bfloat16),
        "w2f": jnp.transpose(raw["w2"], (0, 2, 1))
                  .reshape(planes, 3 * planes).astype(jnp.bfloat16),
    }
    kp["s1"], kp["b1"] = fold(raw["bn1"])
    kp["s2"], kp["b2"] = fold(raw["bn2"])
    if has_proj:
        kp["ws"] = raw["ws"][:, :, 0].astype(jnp.bfloat16)
        kp["ss"], kp["bs"] = fold(raw["bns"])
    return raw, kp


# ------------------------- pure-JAX reference (check) ------------------------

def ref_forward(x, raw, stride, eps=1e-5):
    def conv(y, w, s, p):
        return jax.lax.conv_general_dilated(
            y, w, (s,), [(p, p)], dimension_numbers=("NCH", "OIH", "NCH"))

    def bn(y, params):
        g, b, m, v = params
        return ((y - m[None, :, None]) / jnp.sqrt(v[None, :, None] + eps)
                * g[None, :, None] + b[None, :, None])

    out = jax.nn.relu(bn(conv(x, raw["w1"], stride, 1), raw["bn1"]))
    out = bn(conv(out, raw["w2"], 1, 1), raw["bn2"])
    if raw["ws"] is not None:
        sc = bn(conv(x, raw["ws"], stride, 0), raw["bns"])
    else:
        sc = x
    return jax.nn.relu(out + sc)


if __name__ == "__main__":
    key = jax.random.PRNGKey(0)
    configs = [
        # (N, in_planes, planes, L, stride)
        (2, 8, 8, 16, 1),   # identity-shortcut path (what ResLstm's resconv64_* uses)
        (2, 4, 8, 16, 2),   # projection + strided-downsample path
    ]
    for (N, in_planes, planes, L, stride) in configs:
        key, kx, kw = jax.random.split(key, 3)
        x = jax.random.normal(kx, (N, in_planes, L), jnp.float32)
        raw, kp = init_params(kw, in_planes, planes, stride)

        out = jax.block_until_ready(basic_block_pallas(x, kp, stride))
        ref = jax.block_until_ready(ref_forward(x, raw, stride))

        assert out.shape == ref.shape, (out.shape, ref.shape)
        # bf16 matmul operands with f32 accumulation -> loosened tolerance.
        np.testing.assert_allclose(np.asarray(out), np.asarray(ref),
                                   rtol=3e-2, atol=3e-2)

    print("KERNEL_OK")
</pallas_src>

<mosaic_0001>
module attributes {stable_mosaic.version = 11 : i64} {
  func.func @kernel(%arg0: i32, %arg1: memref<1x8x36xf32, #tpu.memory_space<vmem>>, %arg2: memref<8x24xbf16, #tpu.memory_space<vmem>>, %arg3: memref<8x1xf32, #tpu.memory_space<vmem>>, %arg4: memref<8x1xf32, #tpu.memory_space<vmem>>, %arg5: memref<8x24xbf16, #tpu.memory_space<vmem>>, %arg6: memref<8x1xf32, #tpu.memory_space<vmem>>, %arg7: memref<8x1xf32, #tpu.memory_space<vmem>>, %arg8: memref<1x36xf32, #tpu.memory_space<vmem>>, %arg9: memref<1x8x36xf32, #tpu.memory_space<vmem>>) attributes {dimension_semantics = [#tpu.dimension_semantics<parallel>], iteration_bounds = array<i64: 1>, scalar_prefetch = 0 : i64, scratch_operands = 0 : i64, tpu.core_type = #tpu.core_type<tc>, window_params = [{transform_indices = @transform_0, window_bounds = array<i64: 1, 8, 36>}, {pipeline_mode = #tpu.pipeline_mode<synchronous>, transform_indices = @transform_1, window_bounds = array<i64: 8, 24>}, {pipeline_mode = #tpu.pipeline_mode<synchronous>, transform_indices = @transform_2, window_bounds = array<i64: 8, 1>}, {pipeline_mode = #tpu.pipeline_mode<synchronous>, transform_indices = @transform_3, window_bounds = array<i64: 8, 1>}, {pipeline_mode = #tpu.pipeline_mode<synchronous>, transform_indices = @transform_4, window_bounds = array<i64: 8, 24>}, {pipeline_mode = #tpu.pipeline_mode<synchronous>, transform_indices = @transform_5, window_bounds = array<i64: 8, 1>}, {pipeline_mode = #tpu.pipeline_mode<synchronous>, transform_indices = @transform_6, window_bounds = array<i64: 8, 1>}, {pipeline_mode = #tpu.pipeline_mode<synchronous>, transform_indices = @transform_7, window_bounds = array<i64: 1, 36>}, {transform_indices = @transform_8, window_bounds = array<i64: 1, 8, 36>}]} {
    %c0 = arith.constant 0 : index
    %c0_0 = arith.constant 0 : index
    %c0_1 = arith.constant 0 : index
    %0 = vector.load %arg1[%c0, %c0_0, %c0_1] : memref<1x8x36xf32, #tpu.memory_space<vmem>>, vector<1x8x36xf32>
    %1 = vector.shape_cast %0 : vector<1x8x36xf32> to vector<8x36xf32>
    %cst = arith.constant 0.000000e+00 : f32
    %2 = vector.broadcast %cst : f32 to vector<8x1xf32>
    %3 = tpu.concatenate %2, %1, %2 in 1 : vector<8x1xf32>, vector<8x36xf32>, vector<8x1xf32> -> vector<8x38xf32>
    %4 = vector.extract_strided_slice %3 {offsets = [0, 0], sizes = [8, 36], strides = [1, 1]} : vector<8x38xf32> to vector<8x36xf32>
    %5 = vector.extract_strided_slice %3 {offsets = [0, 1], sizes = [8, 36], strides = [1, 1]} : vector<8x38xf32> to vector<8x36xf32>
    %6 = vector.extract_strided_slice %3 {offsets = [0, 2], sizes = [8, 36], strides = [1, 1]} : vector<8x38xf32> to vector<8x36xf32>
    %7 = tpu.concatenate %4, %5, %6 in 0 : vector<8x36xf32>, vector<8x36xf32>, vector<8x36xf32> -> vector<24x36xf32>
    %8 = arith.truncf %7 : vector<24x36xf32> to vector<24x36xbf16>
    %c0_2 = arith.constant 0 : index
    %c0_3 = arith.constant 0 : index
    %9 = vector.load %arg2[%c0_2, %c0_3] : memref<8x24xbf16, #tpu.memory_space<vmem>>, vector<8x24xbf16>
    %cst_4 = arith.constant dense<0.000000e+00> : vector<8x36xf32>
    %10 = tpu.matmul %9, %8, %cst_4 {dimension_numbers = #tpu.dot_dimension_numbers<[1], [0], [0], [1], [0, 0, 1, 1], [], []>} : vector<8x24xbf16>, vector<24x36xbf16>, vector<8x36xf32> -> vector<8x36xf32>
    %c0_5 = arith.constant 0 : index
    %c0_6 = arith.constant 0 : index
    %11 = vector.load %arg3[%c0_5, %c0_6] : memref<8x1xf32, #tpu.memory_space<vmem>>, vector<8x1xf32>
    %12 = vector.broadcast %11 : vector<8x1xf32> to vector<8x36xf32>
    %13 = arith.mulf %10, %12 : vector<8x36xf32>
    %c0_7 = arith.constant 0 : index
    %c0_8 = arith.constant 0 : index
    %14 = vector.load %arg4[%c0_7, %c0_8] : memref<8x1xf32, #tpu.memory_space<vmem>>, vector<8x1xf32>
    %15 = vector.broadcast %14 : vector<8x1xf32> to vector<8x36xf32>
    %16 = arith.addf %13, %15 : vector<8x36xf32>
    %cst_9 = arith.constant 0.000000e+00 : f32
    %17 = vector.broadcast %cst_9 : f32 to vector<8x36xf32>
    %18 = arith.maximumf %16, %17 : vector<8x36xf32>
    %c0_10 = arith.constant 0 : index
    %c0_11 = arith.constant 0 : index
    %19 = vector.load %arg8[%c0_10, %c0_11] : memref<1x36xf32, #tpu.memory_space<vmem>>, vector<1x36xf32>
    %20 = vector.broadcast %19 : vector<1x36xf32> to vector<8x36xf32>
    %21 = arith.mulf %18, %20 : vector<8x36xf32>
    %cst_12 = arith.constant 0.000000e+00 : f32
    %22 = vector.broadcast %cst_12 : f32 to vector<8x1xf32>
    %23 = tpu.concatenate %22, %21, %22 in 1 : vector<8x1xf32>, vector<8x36xf32>, vector<8x1xf32> -> vector<8x38xf32>
    %24 = vector.extract_strided_slice %23 {offsets = [0, 0], sizes = [8, 36], strides = [1, 1]} : vector<8x38xf32> to vector<8x36xf32>
    %25 = vector.extract_strided_slice %23 {offsets = [0, 1], sizes = [8, 36], strides = [1, 1]} : vector<8x38xf32> to vector<8x36xf32>
    %26 = vector.extract_strided_slice %23 {offsets = [0, 2], sizes = [8, 36], strides = [1, 1]} : vector<8x38xf32> to vector<8x36xf32>
    %27 = tpu.concatenate %24, %25, %26 in 0 : vector<8x36xf32>, vector<8x36xf32>, vector<8x36xf32> -> vector<24x36xf32>
    %28 = arith.truncf %27 : vector<24x36xf32> to vector<24x36xbf16>
    %c0_13 = arith.constant 0 : index
    %c0_14 = arith.constant 0 : index
    %29 = vector.load %arg5[%c0_13, %c0_14] : memref<8x24xbf16, #tpu.memory_space<vmem>>, vector<8x24xbf16>
    %cst_15 = arith.constant dense<0.000000e+00> : vector<8x36xf32>
    %30 = tpu.matmul %29, %28, %cst_15 {dimension_numbers = #tpu.dot_dimension_numbers<[1], [0], [0], [1], [0, 0, 1, 1], [], []>} : vector<8x24xbf16>, vector<24x36xbf16>, vector<8x36xf32> -> vector<8x36xf32>
    %c0_16 = arith.constant 0 : index
    %c0_17 = arith.constant 0 : index
    %31 = vector.load %arg6[%c0_16, %c0_17] : memref<8x1xf32, #tpu.memory_space<vmem>>, vector<8x1xf32>
    %32 = vector.broadcast %31 : vector<8x1xf32> to vector<8x36xf32>
    %33 = arith.mulf %30, %32 : vector<8x36xf32>
    %c0_18 = arith.constant 0 : index
    %c0_19 = arith.constant 0 : index
    %34 = vector.load %arg7[%c0_18, %c0_19] : memref<8x1xf32, #tpu.memory_space<vmem>>, vector<8x1xf32>
    %35 = vector.broadcast %34 : vector<8x1xf32> to vector<8x36xf32>
    %36 = arith.addf %33, %35 : vector<8x36xf32>
    %37 = arith.addf %36, %1 : vector<8x36xf32>
    %cst_20 = arith.constant 0.000000e+00 : f32
    %38 = vector.broadcast %cst_20 : f32 to vector<8x36xf32>
    %39 = arith.maximumf %37, %38 : vector<8x36xf32>
    %c0_21 = arith.constant 0 : index
    %c0_22 = arith.constant 0 : index
    %c0_23 = arith.constant 0 : index
    %40 = vector.load %arg9[%c0_21, %c0_22, %c0_23] : memref<1x8x36xf32, #tpu.memory_space<vmem>>, vector<1x8x36xf32>
    %41 = vector.shape_cast %40 : vector<1x8x36xf32> to vector<8x36xf32>
    %42 = vector.shape_cast %39 : vector<8x36xf32> to vector<1x8x36xf32>
    tpu.vector_store %arg9[%c0_21, %c0_22, %c0_23], %42 {strides = array<i32>} : memref<1x8x36xf32, #tpu.memory_space<vmem>>, vector<1x8x36xf32>,
    return
  }
  func.func @transform_0(%arg0: i32) -> (i32, i32, i32) {
    %c0_i32 = arith.constant 0 : i32
    %c0_i32_0 = arith.constant 0 : i32
    %c0_i32_1 = arith.constant 0 : i32
    return %arg0, %c0_i32, %c0_i32_0 : i32, i32, i32
  }
  func.func @transform_1(%arg0: i32) -> (i32, i32) {
    %c0_i32 = arith.constant 0 : i32
    %c0_i32_0 = arith.constant 0 : i32
    %c0_i32_1 = arith.constant 0 : i32
    return %c0_i32, %c0_i32_0 : i32, i32
  }
  func.func @transform_2(%arg0: i32) -> (i32, i32) {
    %c0_i32 = arith.constant 0 : i32
    %c0_i32_0 = arith.constant 0 : i32
    %c0_i32_1 = arith.constant 0 : i32
    return %c0_i32, %c0_i32_0 : i32, i32
  }
  func.func @transform_3(%arg0: i32) -> (i32, i32) {
    %c0_i32 = arith.constant 0 : i32
    %c0_i32_0 = arith.constant 0 : i32
    %c0_i32_1 = arith.constant 0 : i32
    return %c0_i32, %c0_i32_0 : i32, i32
  }
  func.func @transform_4(%arg0: i32) -> (i32, i32) {
    %c0_i32 = arith.constant 0 : i32
    %c0_i32_0 = arith.constant 0 : i32
    %c0_i32_1 = arith.constant 0 : i32
    return %c0_i32, %c0_i32_0 : i32, i32
  }
  func.func @transform_5(%arg0: i32) -> (i32, i32) {
    %c0_i32 = arith.constant 0 : i32
    %c0_i32_0 = arith.constant 0 : i32
    %c0_i32_1 = arith.constant 0 : i32
    return %c0_i32, %c0_i32_0 : i32, i32
  }
  func.func @transform_6(%arg0: i32) -> (i32, i32) {
    %c0_i32 = arith.constant 0 : i32
    %c0_i32_0 = arith.constant 0 : i32
    %c0_i32_1 = arith.constant 0 : i32
    return %c0_i32, %c0_i32_0 : i32, i32
  }
  func.func @transform_7(%arg0: i32) -> (i32, i32) {
    %c0_i32 = arith.constant 0 : i32
    %c0_i32_0 = arith.constant 0 : i32
    %c0_i32_1 = arith.constant 0 : i32
    return %c0_i32, %c0_i32_0 : i32, i32
  }
  func.func @transform_8(%arg0: i32) -> (i32, i32, i32) {
    %c0_i32 = arith.constant 0 : i32
    %c0_i32_0 = arith.constant 0 : i32
    %c0_i32_1 = arith.constant 0 : i32
    return %arg0, %c0_i32, %c0_i32_0 : i32, i32, i32
  }
}

</mosaic_0001>

<bundles_post_ra>
// kernel: tpu_custom_call.1
= control target key start
LH: loop header
LB: loop body
LE: loop exit
PB: predicated region body
PF: predicated region fallthrough
CT: control target
= control target key end

     0   :  { %s204_s29 = smov 1   ;;  %s309_s0 = inlined_call_operand.vmem [shape: f32[1,8,36], index: 0, kind: input, shape index: {}]   ;;  %s310_s1 = inlined_call_operand.vmem [shape: bf16[8,24], index: 1, kind: input, shape index: {}]   ;;  %s311_s2 = inlined_call_operand.vmem [shape: f32[8,1], index: 2, kind: input, shape index: {}]   ;;  %s312_s3 = inlined_call_operand.vmem [shape: f32[8,1], index: 3, kind: input, shape index: {}]   ;;  %s313_s4 = inlined_call_operand.vmem [shape: bf16[8,24], index: 4, kind: input, shape index: {}]   ;;  %s314_s5 = inlined_call_operand.vmem [shape: f32[8,1], index: 5, kind: input, shape index: {}]   ;;  %s315_s6 = inlined_call_operand.vmem [shape: f32[8,1], index: 6, kind: input, shape index: {}]   ;;  %s316_s7 = inlined_call_operand.vmem [shape: f32[1,36], index: 7, kind: input, shape index: {}]   ;;  %s317_s8 = inlined_call_operand.hbm [shape: f32[1,8,36], index: 8, kind: output, shape index: {}]  }
   0x1   :  { %v258_v0 = vld [vmem:[%s309_s0] sm:$0xff] }
   0x2   :  { %33 = vrot.lane.b32.xlu0 %v258_v0, %s204_s29 }
   0x3   :  { %13 = vsyncpa [#allocation3], 0  ;;  %vm36_vm0 = vcmask 7168   ;;  %vm38_vm1 = vcmask 302080   ;;  %s205_s30 = smov 127   ;;  %s206_s9 = smov 126  }
   0x4   :  { %v71_v4 = vld [vmem:[%s311_s2] sm:$0xff]  ;;  %v207_v6 = vmov 0   ;;  %vm54_vm2 = vcmask 1043456   ;;  %vm208_vm3 = vmmov 1   ;;  %vm50_vm5 = vcmask 195584   ;;  %s151_s21 = sshll.u32 %s317_s8, 4  ;;  %s152_s21 = int_to_ptr.hbm [resolvable:$true] %s151_s21 }
   0x5   :  { %v78_v5 = vld [vmem:[%s312_s3] sm:$0xff]  ;;  %174 = vset.pattern.permute.xlu1 %v207_v6  ;;  %175 = vset.pattern.permute.xlu2 %v207_v6  ;;  %vm274_vm4 = vmpackc.low %vm208_vm3, %vm38_vm1  ;;  %vm142_vm6 = vcmask 293888  }
   0x6   :  { %81 = vperm.xlu2 %175, %v78_v5   ;;  %176 = vset.pattern.permute.xlu0 %v207_v6  ;;  %v49_v13 = vld [vmem:[%s310_s1] sm:$0xf] }
   0x7   :  { %v177_v18 = vld [vmem:[%s316_s7] ss:$0 sm:$0xff] }
   0x8   :  { %v126_v23 = vld [vmem:[%s314_s5] sm:$0xff] }
   0x9   :  { %v133_v27 = vld [vmem:[%s315_s6] sm:$0xff]  ;;  %s209_s6 = smov [#allocation2]  }
   0xa   :  { %v106_v33 = vld [vmem:[%s313_s4] sm:$0xf]  ;;  %s149_s18 = sshll.u32 %s209_s6, 4  ;;  %s150_s18 = int_to_ptr.vmem [resolvable:$true] %s149_s18 }
  0x60   :  { %v82_v16 = vpop.permute.xlu2 %81 }
  0x74   :  { %v34_v1 = vpop.permute.xlu0 %33 }
  0x75   :  { %v37_v2 = vsel %vm36_vm0, 0.0, %v34_v1 }
  0x76   :  { %v39_v3 = vsel %vm38_vm1, %v37_v2, 0.0 }
  0x77   :  { %41 = vrot.lane.b32.xlu1 %v39_v3, %s205_s30  ;;  %44 = vrot.lane.b32.xlu0 %v39_v3, %s206_s9 }
  0x7f   :  { %74 = vperm.xlu1 %174, %v71_v4  }
  0xe9   :  { %v45_v7 = vpop.permute.xlu0 %44  ;;  %v42_v9 = vpop.permute.xlu1 %41 }
  0xea   :  { %v48_v8 = vpack.c.bf16 %v45_v7, %v45_v7  ;;  %v161_v12 = vpack.c.bf16 %v42_v9, %v37_v2 }
  0xec   :  { %v56_v10 = vsel %vm54_vm2, %v48_v8, 0 }
  0xed   :  { %64 = vmatpush.bf16.msra.mxu0 %v56_v10 }
  0xf1   :  { %162 = vmatpush.bf16.msk.msra.mxu0 %vm274_vm4, %v161_v12  ;;  %v75_v14 = vpop.permute.xlu1 %74 }
  0xf4   :  { %163 = vmatmul.msk.bf16.vlgmr.msra.gmra.mxu0 %vm50_vm5, %v49_v13 }
 0x171   :  { %v67_v15 = vpop.f32.mrf.mxu0 }
 0x172   :  { %v77_v17 = vmul.f32 %v75_v14, %v67_v15 }
 0x174   :  { %v84_v19 = vadd.f32 %v82_v16, %v77_v17 }
 0x176   :  { %v85_v20 = vmax.f32 %v84_v19, 0.0 }
 0x178   :  { %v90_v21 = vmul.f32 %v177_v18, %v85_v20 }
 0x179   :  { %v69_v22 = vpop.f32.mrf.mxu0 }
 0x17a   :  { %92 = vrot.lane.b32.xlu2 %v90_v21, %s204_s29 }
 0x182   :  { %129 = vperm.xlu2 %175, %v126_v23  }
 0x1d4   :  { %v93_v24 = vpop.permute.xlu2 %92 }
 0x1d5   :  { %v95_v25 = vsel %vm36_vm0, 0.0, %v93_v24 }
 0x1d6   :  { %v96_v26 = vsel %vm38_vm1, %v95_v25, 0.0 }
 0x1d7   :  { %98 = vrot.lane.b32.xlu1 %v96_v26, %s205_s30  ;;  %101 = vrot.lane.b32.xlu0 %v96_v26, %s206_s9 }
 0x1dc   :  { %v130_v34 = vpop.permute.xlu2 %129 }
 0x1df   :  { %136 = vperm.xlu0 %176, %v133_v27  }
 0x249   :  { %v102_v28 = vpop.permute.xlu0 %101  ;;  %v99_v30 = vpop.permute.xlu1 %98 }
 0x24a   :  { %v105_v29 = vpack.c.bf16 %v102_v28, %v102_v28  ;;  %v165_v32 = vpack.c.bf16 %v99_v30, %v95_v25 }
 0x24c   :  { %v111_v31 = vsel %vm54_vm2, %v105_v29, 0 }
 0x24d   :  { %119 = vmatpush.bf16.msra.mxu1 %v111_v31 }
 0x251   :  { %166 = vmatpush.bf16.msk.msra.mxu1 %vm274_vm4, %v165_v32  ;;  %v137_v36 = vpop.permute.xlu0 %136 }
 0x254   :  { %167 = vmatmul.msk.bf16.vlgmr.msra.gmra.mxu1 %vm50_vm5, %v106_v33 }
 0x2d1   :  { %v122_v35 = vpop.f32.mrf.mxu1 }
 0x2d2   :  { %v132_v37 = vmul.f32 %v130_v34, %v122_v35 }
 0x2d4   :  { %v139_v38 = vadd.f32 %v137_v36, %v132_v37 }
 0x2d6   :  { %v140_v39 = vadd.f32 %v139_v38, %v258_v0 }
 0x2d8   :  { %v141_v40 = vmax.f32 %v140_v39, 0.0 }
 0x2d9   :  { %v124_v41 = vpop.f32.mrf.mxu1 }
 0x2da   :  { %143 = vst.msk [vmem:[#allocation2] sm:$0xff] %vm142_vm6, %v141_v40 }
 0x2db   :  { %154 = dma.vmem_to_hbm [thread:$0]  %s150_s18, 128, %s152_s21, [#allocation3]  }
 0x2dc   :  { %202 = dma.done.wait [#allocation3], 128  }
 0x2dd   :  { %203 = vsyncadd [#allocation3], 4294967168 }
 0x2de   :  { %159 = vsyncpa [#allocation3], 1 }

</bundles_post_ra>
